<compile_context>
chip_gen: v7x
topology: tpu7x:2x2x1
jax: 0.10.0
libtpu: 0.0.40
codegen_flags: <defaults>
</compile_context>

<pallas_src>
import jax
import jax.numpy as jnp
from jax.experimental import pallas as pl
from jax.experimental.pallas import tpu as pltpu

EPS = 1e-5


# ----------------------------------------------------------------------------
# Weight preprocessing (tiny, done once per call in the XLA wrapper)
# ----------------------------------------------------------------------------
def _make_band(w_oihw, W):
    """PyTorch (C_out, C_in, 3, 3) conv weight -> (3*W*C, W*C) stacked banded weight.

    band[kh, w_in*C + ci, w_out*C + co] = w[co, ci, kh, kw] with kw = w_in - w_out + 1
    (zero when kw is outside {0,1,2}), so one (R, 3*W*C) x (3*W*C, W*C) matmul
    applies all 3x3 taps and the width-side zero padding at once.  Row blocks of
    the stacked weight are ordered [kh=0 (up tap), kh=1 (center), kh=2 (down)].
    """
    wk = jnp.transpose(w_oihw.astype(jnp.float32), (2, 3, 1, 0))   # (kh, kw, ci, co)
    C = wk.shape[2]
    w_in = jnp.arange(W)[None, :, None]
    w_out = jnp.arange(W)[None, None, :]
    kw = jnp.arange(3)[:, None, None]
    sel = (w_in == w_out + kw - 1).astype(jnp.float32)             # (3, W, W)
    band = jnp.einsum('xab,yxio->yaibo', sel, wk)                  # (kh, w_in, ci, w_out, co)
    return band.reshape(3 * W * C, W * C)


def _channel_fold(W, C):
    """(W*C, W*C) projection: lane-wise stats -> per-channel mean tiled over W."""
    # TODO(synk): at large W*C replace this (L,L) matmul/VMEM cost with an XLU
    # sublane-mean over a (W, C) relayout of the stats row.
    lanes = jnp.arange(W * C)
    same_channel = (lanes[:, None] % C) == (lanes[None, :] % C)
    return same_channel.astype(jnp.float32) / W


# ----------------------------------------------------------------------------
# Pallas kernel
# ----------------------------------------------------------------------------
def _resblock_kernel(x_ref, band1_ref, band2_ref, fold_ref,
                     top_ref, bot_ref,
                     g1_ref, be1_ref, g2_ref, be2_ref,
                     out_ref):
    """All refs are lane-dense 2-D slabs.

    x_ref     : (N*H, W*C) input
    band*_ref : (3*W*C, W*C) stacked banded conv weights ([up; center; down])
    fold_ref  : (W*C, W*C) per-channel averaging projection
    top/bot   : (N*H, 1) f32 0/1 validity masks for the h-1 / h+1 vertical taps
                (cover both the H zero-padding and the batch boundary)
    g*/be*    : (1, W*C) gamma/beta pre-tiled over W
    out_ref   : (N*H, W*C)
    """
    R, L = x_ref.shape
    x2d = x_ref[...]
    fold = fold_ref[...]
    top = top_ref[...]                      # (R, 1)
    bot = bot_ref[...]                      # (R, 1)
    inv_rows = 1.0 / R

    def conv3x3(src, band_ref):
        # Fused 3-tap conv: one K=3L matmul against the stacked banded weight.
        up = pltpu.roll(src, shift=1, axis=0) * top        # up[r] = src[r-1], masked
        dn = pltpu.roll(src, shift=R - 1, axis=0) * bot    # dn[r] = src[r+1], masked
        wide = jnp.concatenate([up, src, dn], axis=1)      # (R, 3L) lane-dense
        return jnp.dot(wide, band_ref[...], preferred_element_type=jnp.float32)

    def batchnorm(y, g_row, b_row):
        # One-pass stats: stack [sum(y); sum(y^2)] and fold to per-channel with a
        # single matmul.  var = E[y^2] - mean^2 (biased), clamped for safety.
        s1 = jnp.sum(y, axis=0, keepdims=True)             # (1, L)
        s2 = jnp.sum(y * y, axis=0, keepdims=True)         # (1, L)
        stats = jnp.concatenate([s1, s2], axis=0) * inv_rows   # (2, L)
        folded = jnp.dot(stats, fold, preferred_element_type=jnp.float32)  # (2, L)
        mean = folded[0:1, :]
        var = jnp.maximum(folded[1:2, :] - mean * mean, 0.0)
        scale = jax.lax.rsqrt(var + EPS) * g_row           # (1, L)
        return (y - mean) * scale + b_row

    out1 = jnp.maximum(
        batchnorm(conv3x3(x2d, band1_ref), g1_ref[...], be1_ref[...]), 0.0)
    out2 = batchnorm(conv3x3(out1, band2_ref), g2_ref[...], be2_ref[...])
    out_ref[...] = jnp.maximum(out2 + x2d, 0.0)


# ----------------------------------------------------------------------------
# Wrapper (PyTorch-style NCHW interface)
# ----------------------------------------------------------------------------
def residual_block_pallas(x_nchw, params):
    w1, b1, g1, be1, w2, b2, g2, be2 = params
    del b1, b2  # conv biases are exactly cancelled by the train-mode BN mean subtraction
    N, C, H, W = x_nchw.shape
    R, L = N * H, W * C

    # Design assumptions (lane-dense slab, everything resident in VMEM).
    assert L % 128 == 0, "W*C must be a multiple of 128 for the lane-dense layout"
    assert H >= 2, "kernel assumes H >= 2 for the vertical-tap masks"
    approx_vmem = (7 * L * L + 6 * R * L) * 4   # 2 stacked bands + fold + ~6 live slabs
    assert approx_vmem < 48 * 1024 * 1024, (
        "shape too large for the monolithic resident-slab design; "
        "use the row-gridded variant (see TODO below)")

    # Single boundary transpose NCHW -> NHWC; the (N,H,W,C)->(N*H, W*C) reshape
    # is contiguous, i.e. metadata-only.
    # TODO(synk): keep activations NHWC end-to-end in the surrounding model (or
    # fold the relayout into the kernel) to avoid these two HBM round trips.
    x2d = jnp.transpose(x_nchw, (0, 2, 3, 1)).astype(jnp.float32).reshape(R, L)

    # TODO(synk): for large W*C switch to 9 per-(kh,kw) (C,C) weight tiles +
    # lane rolls instead of the O((W*C)^2) banded weights.
    band1 = _make_band(w1, W)
    band2 = _make_band(w2, W)
    fold = _channel_fold(W, C)
    tile_row = lambda v: jnp.tile(v.astype(jnp.float32), W).reshape(1, L)

    # Precomputed vertical-tap validity masks (layout constants of H).
    h_ids = jnp.arange(R, dtype=jnp.int32) % H
    top_mask = (h_ids >= 1).astype(jnp.float32).reshape(R, 1)
    bot_mask = (h_ids <= H - 2).astype(jnp.float32).reshape(R, 1)

    vmem = pl.BlockSpec(memory_space=pltpu.MemorySpace.VMEM)
    # TODO(synk): for large N*H*W*C add a row grid (block (TR, W*C), bands/fold
    # resident via constant index_map), split BN into stats+apply passes, mark
    # the row axis dimension_semantics=("parallel",) and set vmem_limit_bytes so
    # the pipelined buffers fit v7x's 64 MiB VMEM / feed its second TensorCore.
    out2d = pl.pallas_call(
        _resblock_kernel,
        out_shape=jax.ShapeDtypeStruct((R, L), jnp.float32),
        in_specs=[vmem] * 10,
        out_specs=vmem,
    )(x2d, band1, band2, fold, top_mask, bot_mask,
      tile_row(g1), tile_row(be1), tile_row(g2), tile_row(be2))

    # (N*H, W*C) -> (N, H, W, C) is metadata-only; one transpose back to NCHW.
    return jnp.transpose(out2d.reshape(N, H, W, C), (0, 3, 1, 2))


# ----------------------------------------------------------------------------
# Pure-JAX reference mirroring the PyTorch forward (NCHW, with conv bias)
# ----------------------------------------------------------------------------
def residual_block_reference(x, params):
    w1, b1, g1, be1, w2, b2, g2, be2 = params

    def conv(x, w, b):
        y = jax.lax.conv_general_dilated(
            x, w, window_strides=(1, 1), padding="SAME",
            dimension_numbers=("NCHW", "OIHW", "NCHW"))
        return y + b[None, :, None, None]

    def bn(x, g, be):
        mean = jnp.mean(x, axis=(0, 2, 3), keepdims=True)
        var = jnp.mean((x - mean) ** 2, axis=(0, 2, 3), keepdims=True)
        return (x - mean) * jax.lax.rsqrt(var + EPS) * g[None, :, None, None] \
               + be[None, :, None, None]

    out = jax.nn.relu(bn(conv(x, w1, b1), g1, be1))
    out = bn(conv(out, w2, b2), g2, be2)
    return jax.nn.relu(out + x)


def init_params(key, C):
    ks = jax.random.split(key, 6)
    scale = 1.0 / (C * 9) ** 0.5  # ~ Kaiming-uniform bound used by nn.Conv2d
    w1 = jax.random.uniform(ks[0], (C, C, 3, 3), jnp.float32, -scale, scale)
    b1 = jax.random.uniform(ks[1], (C,), jnp.float32, -scale, scale)
    w2 = jax.random.uniform(ks[2], (C, C, 3, 3), jnp.float32, -scale, scale)
    b2 = jax.random.uniform(ks[3], (C,), jnp.float32, -scale, scale)
    g1 = 1.0 + 0.1 * jax.random.normal(ks[4], (C,), jnp.float32)
    be1 = 0.1 * jax.random.normal(ks[5], (C,), jnp.float32)
    g2 = 1.0 + 0.1 * jax.random.normal(jax.random.fold_in(key, 7), (C,), jnp.float32)
    be2 = 0.1 * jax.random.normal(jax.random.fold_in(key, 8), (C,), jnp.float32)
    return (w1, b1, g1, be1, w2, b2, g2, be2)


if __name__ == "__main__":
    key = jax.random.PRNGKey(0)
    N, C, H, W = 2, 8, 16, 16          # W*C = 128 -> fully lane-dense slab
    kx, kp = jax.random.split(key)
    x = jax.random.normal(kx, (N, C, H, W), jnp.float32)
    params = init_params(kp, C)

    out = jax.block_until_ready(residual_block_pallas(x, params))
    ref = jax.block_until_ready(residual_block_reference(x, params))

    assert out.shape == (N, C, H, W)
    assert jnp.max(jnp.abs(out - ref)) < 1e-4, "mismatch vs JAX reference"
    print("KERNEL_OK")
</pallas_src>

<mosaic_0001>
module attributes {stable_mosaic.version = 11 : i64} {
  func.func @_resblock_kernel(%arg0: memref<32x128xf32, #tpu.memory_space<vmem>>, %arg1: memref<384x128xf32, #tpu.memory_space<vmem>>, %arg2: memref<384x128xf32, #tpu.memory_space<vmem>>, %arg3: memref<128x128xf32, #tpu.memory_space<vmem>>, %arg4: memref<32x1xf32, #tpu.memory_space<vmem>>, %arg5: memref<32x1xf32, #tpu.memory_space<vmem>>, %arg6: memref<1x128xf32, #tpu.memory_space<vmem>>, %arg7: memref<1x128xf32, #tpu.memory_space<vmem>>, %arg8: memref<1x128xf32, #tpu.memory_space<vmem>>, %arg9: memref<1x128xf32, #tpu.memory_space<vmem>>, %arg10: memref<32x128xf32, #tpu.memory_space<vmem>>) attributes {dimension_semantics = [], scalar_prefetch = 0 : i64, scratch_operands = 0 : i64, tpu.core_type = #tpu.core_type<tc>} {
    %c0 = arith.constant 0 : index
    %c0_0 = arith.constant 0 : index
    %0 = vector.load %arg0[%c0, %c0_0] : memref<32x128xf32, #tpu.memory_space<vmem>>, vector<32x128xf32>
    %c0_1 = arith.constant 0 : index
    %c0_2 = arith.constant 0 : index
    %1 = vector.load %arg3[%c0_1, %c0_2] : memref<128x128xf32, #tpu.memory_space<vmem>>, vector<128x128xf32>
    %c0_3 = arith.constant 0 : index
    %c0_4 = arith.constant 0 : index
    %2 = vector.load %arg4[%c0_3, %c0_4] : memref<32x1xf32, #tpu.memory_space<vmem>>, vector<32x1xf32>
    %c0_5 = arith.constant 0 : index
    %c0_6 = arith.constant 0 : index
    %3 = vector.load %arg5[%c0_5, %c0_6] : memref<32x1xf32, #tpu.memory_space<vmem>>, vector<32x1xf32>
    %c1_i32 = arith.constant 1 : i32
    %4 = tpu.dynamic_rotate %0 by %c1_i32 dim 0 : vector<32x128xf32>, i32 -> vector<32x128xf32>
    %5 = vector.broadcast %2 : vector<32x1xf32> to vector<32x128xf32>
    %6 = arith.mulf %4, %5 : vector<32x128xf32>
    %c31_i32 = arith.constant 31 : i32
    %7 = tpu.dynamic_rotate %0 by %c31_i32 dim 0 : vector<32x128xf32>, i32 -> vector<32x128xf32>
    %8 = vector.broadcast %3 : vector<32x1xf32> to vector<32x128xf32>
    %9 = arith.mulf %7, %8 : vector<32x128xf32>
    %10 = tpu.concatenate %6, %0, %9 in 1 : vector<32x128xf32>, vector<32x128xf32>, vector<32x128xf32> -> vector<32x384xf32>
    %c0_7 = arith.constant 0 : index
    %c0_8 = arith.constant 0 : index
    %11 = vector.load %arg1[%c0_7, %c0_8] : memref<384x128xf32, #tpu.memory_space<vmem>>, vector<384x128xf32>
    %cst = arith.constant dense<0.000000e+00> : vector<32x128xf32>
    %12 = tpu.matmul %10, %11, %cst {dimension_numbers = #tpu.dot_dimension_numbers<[1], [0], [0], [1], [0, 0, 1, 1], [], []>} : vector<32x384xf32>, vector<384x128xf32>, vector<32x128xf32> -> vector<32x128xf32>
    %c0_9 = arith.constant 0 : index
    %c0_10 = arith.constant 0 : index
    %13 = vector.load %arg6[%c0_9, %c0_10] : memref<1x128xf32, #tpu.memory_space<vmem>>, vector<1x128xf32>
    %c0_11 = arith.constant 0 : index
    %c0_12 = arith.constant 0 : index
    %14 = vector.load %arg7[%c0_11, %c0_12] : memref<1x128xf32, #tpu.memory_space<vmem>>, vector<1x128xf32>
    %cst_13 = arith.constant dense<0.000000e+00> : vector<128xf32>
    %15 = vector.multi_reduction <add>, %12, %cst_13 [0] : vector<32x128xf32> to vector<128xf32>
    %16 = vector.shape_cast %15 : vector<128xf32> to vector<1x128xf32>
    %17 = arith.mulf %12, %12 : vector<32x128xf32>
    %cst_14 = arith.constant dense<0.000000e+00> : vector<128xf32>
    %18 = vector.multi_reduction <add>, %17, %cst_14 [0] : vector<32x128xf32> to vector<128xf32>
    %19 = vector.shape_cast %18 : vector<128xf32> to vector<1x128xf32>
    %20 = tpu.concatenate %16, %19 in 0 : vector<1x128xf32>, vector<1x128xf32> -> vector<2x128xf32>
    %cst_15 = arith.constant 3.125000e-02 : f32
    %21 = vector.broadcast %cst_15 : f32 to vector<2x128xf32>
    %22 = arith.mulf %20, %21 : vector<2x128xf32>
    %cst_16 = arith.constant dense<0.000000e+00> : vector<2x128xf32>
    %23 = tpu.matmul %22, %1, %cst_16 {dimension_numbers = #tpu.dot_dimension_numbers<[1], [0], [0], [1], [0, 0, 1, 1], [], []>} : vector<2x128xf32>, vector<128x128xf32>, vector<2x128xf32> -> vector<2x128xf32>
    %24 = vector.extract_strided_slice %23 {offsets = [0, 0], sizes = [1, 128], strides = [1, 1]} : vector<2x128xf32> to vector<1x128xf32>
    %25 = vector.extract_strided_slice %23 {offsets = [1, 0], sizes = [1, 128], strides = [1, 1]} : vector<2x128xf32> to vector<1x128xf32>
    %26 = arith.mulf %24, %24 : vector<1x128xf32>
    %27 = arith.subf %25, %26 : vector<1x128xf32>
    %cst_17 = arith.constant 0.000000e+00 : f32
    %28 = vector.broadcast %cst_17 : f32 to vector<1x128xf32>
    %29 = arith.maximumf %27, %28 : vector<1x128xf32>
    %cst_18 = arith.constant 9.99999974E-6 : f32
    %30 = vector.broadcast %cst_18 : f32 to vector<1x128xf32>
    %31 = arith.addf %29, %30 : vector<1x128xf32>
    %32 = math.rsqrt %31 : vector<1x128xf32>
    %33 = arith.mulf %32, %13 : vector<1x128xf32>
    %34 = vector.broadcast %24 : vector<1x128xf32> to vector<32x128xf32>
    %35 = arith.subf %12, %34 : vector<32x128xf32>
    %36 = vector.broadcast %33 : vector<1x128xf32> to vector<32x128xf32>
    %37 = arith.mulf %35, %36 : vector<32x128xf32>
    %38 = vector.broadcast %14 : vector<1x128xf32> to vector<32x128xf32>
    %39 = arith.addf %37, %38 : vector<32x128xf32>
    %cst_19 = arith.constant 0.000000e+00 : f32
    %40 = vector.broadcast %cst_19 : f32 to vector<32x128xf32>
    %41 = arith.maximumf %39, %40 : vector<32x128xf32>
    %c1_i32_20 = arith.constant 1 : i32
    %42 = tpu.dynamic_rotate %41 by %c1_i32_20 dim 0 : vector<32x128xf32>, i32 -> vector<32x128xf32>
    %43 = vector.broadcast %2 : vector<32x1xf32> to vector<32x128xf32>
    %44 = arith.mulf %42, %43 : vector<32x128xf32>
    %c31_i32_21 = arith.constant 31 : i32
    %45 = tpu.dynamic_rotate %41 by %c31_i32_21 dim 0 : vector<32x128xf32>, i32 -> vector<32x128xf32>
    %46 = vector.broadcast %3 : vector<32x1xf32> to vector<32x128xf32>
    %47 = arith.mulf %45, %46 : vector<32x128xf32>
    %48 = tpu.concatenate %44, %41, %47 in 1 : vector<32x128xf32>, vector<32x128xf32>, vector<32x128xf32> -> vector<32x384xf32>
    %c0_22 = arith.constant 0 : index
    %c0_23 = arith.constant 0 : index
    %49 = vector.load %arg2[%c0_22, %c0_23] : memref<384x128xf32, #tpu.memory_space<vmem>>, vector<384x128xf32>
    %cst_24 = arith.constant dense<0.000000e+00> : vector<32x128xf32>
    %50 = tpu.matmul %48, %49, %cst_24 {dimension_numbers = #tpu.dot_dimension_numbers<[1], [0], [0], [1], [0, 0, 1, 1], [], []>} : vector<32x384xf32>, vector<384x128xf32>, vector<32x128xf32> -> vector<32x128xf32>
    %c0_25 = arith.constant 0 : index
    %c0_26 = arith.constant 0 : index
    %51 = vector.load %arg8[%c0_25, %c0_26] : memref<1x128xf32, #tpu.memory_space<vmem>>, vector<1x128xf32>
    %c0_27 = arith.constant 0 : index
    %c0_28 = arith.constant 0 : index
    %52 = vector.load %arg9[%c0_27, %c0_28] : memref<1x128xf32, #tpu.memory_space<vmem>>, vector<1x128xf32>
    %cst_29 = arith.constant dense<0.000000e+00> : vector<128xf32>
    %53 = vector.multi_reduction <add>, %50, %cst_29 [0] : vector<32x128xf32> to vector<128xf32>
    %54 = vector.shape_cast %53 : vector<128xf32> to vector<1x128xf32>
    %55 = arith.mulf %50, %50 : vector<32x128xf32>
    %cst_30 = arith.constant dense<0.000000e+00> : vector<128xf32>
    %56 = vector.multi_reduction <add>, %55, %cst_30 [0] : vector<32x128xf32> to vector<128xf32>
    %57 = vector.shape_cast %56 : vector<128xf32> to vector<1x128xf32>
    %58 = tpu.concatenate %54, %57 in 0 : vector<1x128xf32>, vector<1x128xf32> -> vector<2x128xf32>
    %cst_31 = arith.constant 3.125000e-02 : f32
    %59 = vector.broadcast %cst_31 : f32 to vector<2x128xf32>
    %60 = arith.mulf %58, %59 : vector<2x128xf32>
    %cst_32 = arith.constant dense<0.000000e+00> : vector<2x128xf32>
    %61 = tpu.matmul %60, %1, %cst_32 {dimension_numbers = #tpu.dot_dimension_numbers<[1], [0], [0], [1], [0, 0, 1, 1], [], []>} : vector<2x128xf32>, vector<128x128xf32>, vector<2x128xf32> -> vector<2x128xf32>
    %62 = vector.extract_strided_slice %61 {offsets = [0, 0], sizes = [1, 128], strides = [1, 1]} : vector<2x128xf32> to vector<1x128xf32>
    %63 = vector.extract_strided_slice %61 {offsets = [1, 0], sizes = [1, 128], strides = [1, 1]} : vector<2x128xf32> to vector<1x128xf32>
    %64 = arith.mulf %62, %62 : vector<1x128xf32>
    %65 = arith.subf %63, %64 : vector<1x128xf32>
    %cst_33 = arith.constant 0.000000e+00 : f32
    %66 = vector.broadcast %cst_33 : f32 to vector<1x128xf32>
    %67 = arith.maximumf %65, %66 : vector<1x128xf32>
    %cst_34 = arith.constant 9.99999974E-6 : f32
    %68 = vector.broadcast %cst_34 : f32 to vector<1x128xf32>
    %69 = arith.addf %67, %68 : vector<1x128xf32>
    %70 = math.rsqrt %69 : vector<1x128xf32>
    %71 = arith.mulf %70, %51 : vector<1x128xf32>
    %72 = vector.broadcast %62 : vector<1x128xf32> to vector<32x128xf32>
    %73 = arith.subf %50, %72 : vector<32x128xf32>
    %74 = vector.broadcast %71 : vector<1x128xf32> to vector<32x128xf32>
    %75 = arith.mulf %73, %74 : vector<32x128xf32>
    %76 = vector.broadcast %52 : vector<1x128xf32> to vector<32x128xf32>
    %77 = arith.addf %75, %76 : vector<32x128xf32>
    %78 = arith.addf %77, %0 : vector<32x128xf32>
    %cst_35 = arith.constant 0.000000e+00 : f32
    %79 = vector.broadcast %cst_35 : f32 to vector<32x128xf32>
    %80 = arith.maximumf %78, %79 : vector<32x128xf32>
    %c0_36 = arith.constant 0 : index
    %c0_37 = arith.constant 0 : index
    %81 = vector.load %arg10[%c0_36, %c0_37] : memref<32x128xf32, #tpu.memory_space<vmem>>, vector<32x128xf32>
    tpu.vector_store %arg10[%c0_36, %c0_37], %80 {strides = array<i32>} : memref<32x128xf32, #tpu.memory_space<vmem>>, vector<32x128xf32>,
    return
  }
}

</mosaic_0001>

<bundles_post_ra>
// kernel: tpu_custom_call.1
= control target key start
LH: loop header
LB: loop body
LE: loop exit
PB: predicated region body
PF: predicated region fallthrough
CT: control target
= control target key end

     0   :  { %15 = vsyncpa [#allocation3], 0  ;;  %s1900_s0 = inlined_call_operand.vmem [shape: f32[32,128], index: 0, kind: input, shape index: {}]   ;;  %s1901_s1 = inlined_call_operand.hbm [shape: f32[384,128], index: 1, kind: input, shape index: {}]   ;;  %s1902_s2 = inlined_call_operand.hbm [shape: f32[384,128], index: 2, kind: input, shape index: {}]   ;;  %s1903_s3 = inlined_call_operand.hbm [shape: f32[128,128], index: 3, kind: input, shape index: {}]   ;;  %s1904_s4 = inlined_call_operand.vmem [shape: f32[32,1], index: 4, kind: input, shape index: {}]   ;;  %s1905_s5 = inlined_call_operand.vmem [shape: f32[32,1], index: 5, kind: input, shape index: {}]   ;;  %s1906_s6 = inlined_call_operand.vmem [shape: f32[1,128], index: 6, kind: input, shape index: {}]   ;;  %s1907_s7 = inlined_call_operand.vmem [shape: f32[1,128], index: 7, kind: input, shape index: {}]   ;;  %s1908_s8 = inlined_call_operand.vmem [shape: f32[1,128], index: 8, kind: input, shape index: {}]   ;;  %s1909_s9 = inlined_call_operand.vmem [shape: f32[1,128], index: 9, kind: input, shape index: {}]   ;;  %s1910_s10 = inlined_call_operand.hbm [shape: f32[32,128], index: 10, kind: output, shape index: {}]  }
   0x1   :  { %16 = vsyncpa [#allocation6], 0 }
   0x2   :  { %17 = vsyncpa [#allocation4], 0  ;;  %s1540_s13 = smov [#allocation5]   ;;  %s1541_s15 = smov [#allocation2]  }
   0x3   :  { %s37_s14 = sshll.u32 %s1540_s13, 4  ;;  %s25_s16 = sshll.u32 %s1541_s15, 4  ;;  %s38_s14 = int_to_ptr.vmem [resolvable:$true] %s37_s14  ;;  %s1605_s16 = int_to_ptr.vmem [resolvable:$true] %s25_s16 }
   0x4   :  { %s1446_s19 = scalar_lea.hbm %s1902_s2, 6144 }
   0x5   :  { %p1447_p0 = scmp.ne.s32.totalorder %s1902_s2, %s1446_s19  ;;  %p1450_p1 = scmp.lt.u32.totalorder %s1446_s19, %s1902_s2 }
   0x7   :  { %p1452_p2 = pnand %p1450_p1, %p1447_p0 }
   0x9   :  { %1455 = shalt.err (!%p1452_p2)
}
   0xa   :  { %s1456_s24 = scalar_lea.vmem %s38_s14, 6144  ;;  %p1461_p4 = scmp.lt.s32.totalorder %s38_s14, %s38_s14 }
   0xb   :  { %p1457_p3 = scmp.ne.s32.totalorder %s38_s14, %s1456_s24  ;;  %p1462_p5 = scmp.lt.s32.totalorder %s1456_s24, %s1456_s24 }
   0xd   :  { %p1463_p6 = por %p1462_p5, %p1461_p4 }
   0xf   :  { %p1464_p7 = pnand %p1463_p6, %p1457_p3 }
  0x11   :  { %1467 = shalt.err (!%p1464_p7)
}
  0x12   :  { %s1542_s25 = smov 128   ;;  %s1543_s26 = smov 8  }
  0x13   :  { %43 = dma.hbm_to_vmem [thread:$0]  %s1902_s2, 6144, %s38_s14, [#allocation6], %s1542_s25, %s1542_s25, %s1543_s26  }
  0x14   :  { %s1468_s11 = scalar_lea.hbm %s1901_s1, 6144 }
  0x15   :  { %p1469_p8 = scmp.ne.s32.totalorder %s1901_s1, %s1468_s11  ;;  %p1472_p9 = scmp.lt.u32.totalorder %s1468_s11, %s1901_s1 }
  0x17   :  { %p1474_p10 = pnand %p1472_p9, %p1469_p8 }
  0x19   :  { %1477 = shalt.err (!%p1474_p10)
}
  0x1a   :  { %s1478_s18 = scalar_lea.vmem %s1605_s16, 6144  ;;  %p1483_p12 = scmp.lt.s32.totalorder %s1605_s16, %s1605_s16 }
  0x1b   :  { %p1479_p11 = scmp.ne.s32.totalorder %s1605_s16, %s1478_s18  ;;  %p1484_p13 = scmp.lt.s32.totalorder %s1478_s18, %s1478_s18 }
  0x1d   :  { %p1485_p0 = por %p1484_p13, %p1483_p12 }
  0x1f   :  { %p1486_p1 = pnand %p1485_p0, %p1479_p11 }
  0x21   :  { %1489 = shalt.err (!%p1486_p1)
}
  0x22   :  { %31 = dma.hbm_to_vmem [thread:$0]  %s1901_s1, 6144, %s1605_s16, [#allocation3], %s1542_s25, %s1542_s25, %s1543_s26  }
  0x23   :  { %s1544_s19 = smov [#allocation7]   ;;  %s1490_s23 = scalar_lea.hbm %s1903_s3, 2048 }
  0x24   :  { %s49_s20 = sshll.u32 %s1544_s19, 4  ;;  %p1491_p2 = scmp.ne.s32.totalorder %s1903_s3, %s1490_s23  ;;  %s50_s20 = int_to_ptr.vmem [resolvable:$true] %s49_s20 }
  0x25   :  { %p1494_p3 = scmp.lt.u32.totalorder %s1490_s23, %s1903_s3 }
  0x27   :  { %p1496_p4 = pnand %p1494_p3, %p1491_p2 }
  0x29   :  { %1499 = shalt.err (!%p1496_p4)
}
  0x2a   :  { %s1500_s30 = scalar_lea.vmem %s50_s20, 2048  ;;  %p1505_p6 = scmp.lt.s32.totalorder %s50_s20, %s50_s20 }
  0x2b   :  { %p1501_p5 = scmp.ne.s32.totalorder %s50_s20, %s1500_s30  ;;  %p1506_p7 = scmp.lt.s32.totalorder %s1500_s30, %s1500_s30 }
  0x2d   :  { %p1507_p8 = por %p1506_p7, %p1505_p6 }
  0x2f   :  { %p1508_p9 = pnand %p1507_p8, %p1501_p5 }
  0x31   :  { %1511 = shalt.err (!%p1508_p9)
}
  0x32   :  { %55 = dma.hbm_to_vmem [thread:$0]  %s1903_s3, 2048, %s50_s20, [#allocation6], %s1542_s25, %s1542_s25, %s1543_s26  }
  0x33   :  { %1534 = dma.done.wait [#allocation3], 6144  }
  0x34   :  { %1535 = vsyncadd [#allocation3], 4294961152 }
  0x35   :  { %1536 = dma.done.wait [#allocation6], 8192  }
  0x36   :  { %1537 = vsyncadd [#allocation6], 4294959104  ;;  %v1545_v0 = vmov 0   ;;  %v101_v1 = vld [vmem:[%s1905_s5] sm:$0xff]  ;;  %v99_v3 = vld [vmem:[%s1904_s4 + $0x10] sm:$0xff]  ;;  %vm1547_vm2 = vmmov 0  }
  0x37   :  { %1441 = vset.pattern.permute.xlu1 %v1545_v0  ;;  %1440 = vset.pattern.permute.xlu0 %v1545_v0  ;;  %v97_v2 = vld [vmem:[%s1904_s4] sm:$0xff]  ;;  %v98_v4 = vld [vmem:[%s1904_s4 + $0x8] sm:$0xff]  ;;  %v103_v9 = vld [vmem:[%s1905_s5 + $0x10] sm:$0xff]  ;;  %vm415_vm3 = vcmask 1040384  }
  0x38   :  { %151 = vperm.xlu1 %1441, %v101_v1   ;;  %118 = vperm.xlu0 %1440, %v97_v2   ;;  %v189_v5 = vld [vmem:[#allocation2 + $0x80] sm:$0xff]  ;;  %v190_v6 = vld [vmem:[#allocation2 + $0x88] sm:$0xff]  ;;  %v191_v12 = vld [vmem:[#allocation2 + $0x90] sm:$0xff] }
  0x39   :  { %v173_v7 = vld [vmem:[#allocation2] sm:$0xff]  ;;  %v174_v8 = vld [vmem:[#allocation2 + $0x8] sm:$0xff]  ;;  %v1254_v10 = vpack.c.bf16 %v190_v6, %v189_v5  ;;  %v192_v13 = vld [vmem:[#allocation2 + $0x98] sm:$0xff] }
  0x3a   :  { %v1256_v11 = vpack.c.bf16 %v174_v8, %v173_v7  ;;  %v175_v14 = vld [vmem:[#allocation2 + $0x10] sm:$0xff]  ;;  %v1258_v15 = vpack.c.bf16 %v192_v13, %v191_v12  ;;  %v176_v16 = vld [vmem:[#allocation2 + $0x18] sm:$0xff]  ;;  %v193_v17 = vld [vmem:[#allocation2 + $0xa0] sm:$0xff] }
  0x3b   :  { %v194_v18 = vld [vmem:[#allocation2 + $0xa8] sm:$0xff]  ;;  %1255 = vmatprep.subr.bf16.mxu0 %v1254_v10  ;;  %v205_v20 = vld [vmem:[#allocation2 + $0x100] sm:$0xff]  ;;  %v1260_v22 = vpack.c.bf16 %v176_v16, %v175_v14  ;;  %v207_v27 = vld [vmem:[#allocation2 + $0x110] sm:$0xff] }
  0x3c   :  { %128 = vperm.xlu1 %1441, %v99_v3   ;;  %123 = vperm.xlu0 %1440, %v98_v4   ;;  %v102_v19 = vld [vmem:[%s1905_s5 + $0x8] sm:$0xff]  ;;  %v177_v24 = vld [vmem:[#allocation2 + $0x20] sm:$0xff]  ;;  %v1262_v25 = vpack.c.bf16 %v194_v18, %v193_v17  ;;  %v208_v28 = vld [vmem:[#allocation2 + $0x118] sm:$0xff]  ;;  %v109_v18 = vlaneseq }
  0x3d   :  { %v206_v21 = vld [vmem:[#allocation2 + $0x108] sm:$0xff]  ;;  %1257 = vmatpush3.bf16.msra.mxu0 %v1256_v11  ;;  %v104_v29 = vld [vmem:[%s1905_s5 + $0x18] sm:$0xff]  ;;  %v195_v30 = vld [vmem:[#allocation2 + $0xb0] sm:$0xff]  ;;  %v1290_v32 = vpack.c.bf16 %v208_v28, %v207_v27 }
  0x3e   :  { %v1286_v23 = vpack.c.bf16 %v206_v21, %v205_v20  ;;  %1259 = vmatprep.subr.bf16.mxu0 %v1258_v15  ;;  %v178_v26 = vld [vmem:[#allocation2 + $0x28] sm:$0xff]  ;;  %v196_v31 = vld [vmem:[#allocation2 + $0xb8] sm:$0xff]  ;;  %v209_v34 = vld [vmem:[#allocation2 + $0x120] sm:$0xff] }
  0x3f   :  { %v100_v33 = vld [vmem:[%s1904_s4 + $0x18] sm:$0xff]  ;;  %v210_v35 = vld [vmem:[#allocation2 + $0x128] sm:$0xff]  ;;  %v1264_v36 = vpack.c.bf16 %v178_v26, %v177_v24  ;;  %v1266_v37 = vpack.c.bf16 %v196_v31, %v195_v30  ;;  %v179_v38 = vld [vmem:[#allocation2 + $0x30] sm:$0xff] }
  0x40   :  { %161 = vperm.xlu1 %1441, %v103_v9   ;;  %156 = vperm.xlu0 %1440, %v102_v19   ;;  %v180_v39 = vld [vmem:[#allocation2 + $0x38] sm:$0xff]  ;;  %v197_v40 = vld [vmem:[#allocation2 + $0xc0] sm:$0xff]  ;;  %v1294_v41 = vpack.c.bf16 %v210_v35, %v209_v34  ;;  %v198_v42 = vld [vmem:[#allocation2 + $0xc8] sm:$0xff]  ;;  %v1687_v19 = vshrl.u32 %v109_v18, 7 }
  0x41   :  { %1287 = vmatprep.subr.bf16.mxu1 %v1286_v23  ;;  %1261 = vmatpush3.bf16.msra.mxu0 %v1260_v22  ;;  %v211_v43 = vld [vmem:[#allocation2 + $0x130] sm:$0xff]  ;;  %v212_v44 = vld [vmem:[#allocation2 + $0x138] sm:$0xff]  ;;  %v1268_v45 = vpack.c.bf16 %v180_v39, %v179_v38  ;;  %v181_v46 = vld [vmem:[#allocation2 + $0x40] sm:$0xff]  ;;  %v1270_v47 = vpack.c.bf16 %v198_v42, %v197_v40 }
  0x42   :  { %1289 = vmatpush3.bf16.msra.mxu1 %v1286_v23  ;;  %1263 = vmatprep.subr.bf16.mxu0 %v1262_v25  ;;  %v182_v48 = vld [vmem:[#allocation2 + $0x48] sm:$0xff]  ;;  %v199_v49 = vld [vmem:[#allocation2 + $0xd0] sm:$0xff]  ;;  %v200_v50 = vld [vmem:[#allocation2 + $0xd8] sm:$0xff]  ;;  %v1298_v51 = vpack.c.bf16 %v212_v44, %v211_v43  ;;  %vm111_vm0 = vcmp.lt.s32.totalorder %v1687_v19, 1  ;;  %vm144_vm1 = vcmp.lt.s32.totalorder %v1687_v19, 7 }
  0x43   :  { %1291 = vmatprep.subr.bf16.mxu1 %v1290_v32  ;;  %v213_v52 = vld [vmem:[#allocation2 + $0x140] sm:$0xff]  ;;  %v214_v53 = vld [vmem:[#allocation2 + $0x148] sm:$0xff]  ;;  %v1272_v55 = vpack.c.bf16 %v182_v48, %v181_v46  ;;  %v1274_v56 = vpack.c.bf16 %v200_v50, %v199_v49  ;;  %v183_v57 = vld [vmem:[#allocation2 + $0x50] sm:$0xff] }
  0x44   :  { %166 = vperm.xlu1 %1441, %v104_v29   ;;  %133 = vperm.xlu0 %1440, %v100_v33   ;;  %v1684_v54 = vld [vmem:[%s1900_s0] sm:$0xff]  ;;  %v184_v58 = vld [vmem:[#allocation2 + $0x58] sm:$0xff]  ;;  %v1302_v60 = vpack.c.bf16 %v214_v53, %v213_v52  ;;  %v202_v61 = vld [vmem:[#allocation2 + $0xe8] sm:$0xff] }
  0x45   :  { %1265 = vmatpush3.bf16.msra.mxu0 %v1264_v36  ;;  %285 = vmatprep.mubr.f32.mxu0 %v1684_v54  ;;  %v201_v59 = vld [vmem:[#allocation2 + $0xe0] sm:$0xff]  ;;  %v215_v62 = vld [vmem:[#allocation2 + $0x150] sm:$0xff]  ;;  %v216_v63 = vld [vmem:[#allocation2 + $0x158] sm:$0xff]  ;;  %v1276_v0 = vpack.c.bf16 %v184_v58, %v183_v57  ;;  %v105_v22 = vrot.slane %v1684_v54, 7  ;;  %v140_v24 = vrot.slane %v1684_v54, 1 }
  0x46   :  { %1293 = vmatpush3.bf16.msra.mxu1 %v1290_v32  ;;  %1267 = vmatprep.subr.bf16.mxu0 %v1266_v37  ;;  %v1278_v1 = vpack.c.bf16 %v202_v61, %v201_v59  ;;  %v185_v2 = vld [vmem:[#allocation2 + $0x60] sm:$0xff]  ;;  %v186_v3 = vld [vmem:[#allocation2 + $0x68] sm:$0xff]  ;;  %v203_v4 = vld [vmem:[#allocation2 + $0xf0] sm:$0xff]  ;;  %v1306_v5 = vpack.c.bf16 %v216_v63, %v215_v62  ;;  %v1546_v59 = vmov 0.0|0.0  }
  0x47   :  { %1295 = vmatprep.subr.bf16.mxu1 %v1294_v41  ;;  %v204_v6 = vld [vmem:[#allocation2 + $0xf8] sm:$0xff]  ;;  %v217_v7 = vld [vmem:[#allocation2 + $0x160] sm:$0xff]  ;;  %v218_v8 = vld [vmem:[#allocation2 + $0x168] sm:$0xff]  ;;  %v1280_v9 = vpack.c.bf16 %v186_v3, %v185_v2 }
  0x48   :  { %v1282_v10 = vpack.c.bf16 %v204_v6, %v203_v4  ;;  %v187_v11 = vld [vmem:[#allocation2 + $0x70] sm:$0xff]  ;;  %v188_v12 = vld [vmem:[#allocation2 + $0x78] sm:$0xff]  ;;  %v1310_v13 = vpack.c.bf16 %v218_v8, %v217_v7  ;;  %v1697_v21 = vld [vmem:[%s1900_s0 + $0x8] sm:$0xff] }
  0x49   :  { %1269 = vmatpush3.bf16.msra.mxu0 %v1268_v45  ;;  %v219_v14 = vld [vmem:[#allocation2 + $0x170] sm:$0xff]  ;;  %v220_v15 = vld [vmem:[#allocation2 + $0x178] sm:$0xff]  ;;  %v1284_v16 = vpack.c.bf16 %v188_v12, %v187_v11  ;;  %v141_v25 = vrot.slane %v1697_v21, 1  ;;  %v106_v28 = vrot.slane %v1697_v21, 7  ;;  %v82_v57 = vld [vmem:[#allocation7 + $0x8] sm:$0xff] }
  0x4a   :  { %1297 = vmatpush3.bf16.msra.mxu1 %v1294_v41  ;;  %1271 = vmatprep.subr.bf16.mxu0 %v1270_v47  ;;  %v1314_v17 = vpack.c.bf16 %v220_v15, %v219_v14  ;;  %v1692_v20 = vld [vmem:[%s1900_s0 + $0x18] sm:$0xff]  ;;  %v1713_v29 = vld [vmem:[%s1900_s0 + $0x10] sm:$0xff]  ;;  %v85_v63 = vld [vmem:[#allocation7 + $0x20] sm:$0xff] }
  0x4b   :  { %1299 = vmatprep.subr.bf16.mxu1 %v1298_v51  ;;  %v108_v23 = vrot.slane %v1692_v20, 7  ;;  %v147_v27 = vsel %vm144_vm1, %v140_v24, %v141_v25  ;;  %v107_v34 = vrot.slane %v1713_v29, 7  ;;  %v114_v35 = vsel %vm111_vm0, %v105_v22, %v106_v28  ;;  %v84_v61 = vld [vmem:[#allocation7 + $0x18] sm:$0xff]  ;;  %v87_v2 = vld [vmem:[#allocation7 + $0x30] sm:$0xff]  ;;  %v90_v6 = vld [vmem:[#allocation7 + $0x48] sm:$0xff] }
  0x4c   :  { %v142_v36 = vrot.slane %v1713_v29, 1  ;;  %v143_v37 = vrot.slane %v1692_v20, 1  ;;  %v88_v3 = vld [vmem:[#allocation7 + $0x38] sm:$0xff]  ;;  %v91_v8 = vld [vmem:[#allocation7 + $0x50] sm:$0xff]  ;;  %v93_v11 = vld [vmem:[#allocation7 + $0x60] sm:$0xff] }
  0x4d   :  { %1273 = vmatpush3.bf16.msra.mxu0 %v1272_v55  ;;  %v115_v26 = vsel %vm111_vm0, %v108_v23, %v105_v22  ;;  %v113_v41 = vsel %vm111_vm0, %v106_v28, %v107_v34  ;;  %v112_v50 = vsel %vm111_vm0, %v107_v34, %v108_v23  ;;  %v1770_v4 = vpack.c.bf16 %v88_v3, %v87_v2  ;;  %v94_v12 = vld [vmem:[#allocation7 + $0x68] sm:$0xff]  ;;  %v95_v14 = vld [vmem:[#allocation7 + $0x70] sm:$0xff]  ;;  %v96_v15 = vld [vmem:[#allocation7 + $0x78] sm:$0xff] }
  0x4e   :  { %1301 = vmatpush3.bf16.msra.mxu1 %v1298_v51  ;;  %1275 = vmatprep.subr.bf16.mxu0 %v1274_v56  ;;  %v145_v42 = vsel %vm144_vm1, %v142_v36, %v143_v37  ;;  %v146_v43 = vsel %vm144_vm1, %v141_v25, %v142_v36  ;;  %v148_v49 = vsel %vm144_vm1, %v143_v37, %v140_v24  ;;  %v81_v56 = vld [vmem:[#allocation7] sm:$0xff] }
  0x4f   :  { %1303 = vmatprep.subr.bf16.mxu1 %v1302_v60  ;;  %v1757_v58 = vpack.c.bf16 %v82_v57, %v81_v56 }
  0x51   :  { %1277 = vmatpush3.bf16.msra.mxu0 %v1276_v0  ;;  %v86_v0 = vld [vmem:[#allocation7 + $0x28] sm:$0xff] }
  0x52   :  { %1305 = vmatpush3.bf16.msra.mxu1 %v1302_v60  ;;  %1279 = vmatprep.subr.bf16.mxu0 %v1278_v1  ;;  %v83_v60 = vld [vmem:[#allocation7 + $0x10] sm:$0xff]  ;;  %v1766_v1 = vpack.c.bf16 %v86_v0, %v85_v63 }
  0x53   :  { %1307 = vmatprep.subr.bf16.mxu1 %v1306_v5  ;;  %v1762_v62 = vpack.c.bf16 %v84_v61, %v83_v60 }
  0x55   :  { %1281 = vmatpush3.bf16.msra.mxu0 %v1280_v9  ;;  %v92_v9 = vld [vmem:[#allocation7 + $0x58] sm:$0xff] }
  0x56   :  { %1309 = vmatpush3.bf16.msra.mxu1 %v1306_v5  ;;  %1283 = vmatprep.subr.bf16.mxu0 %v1282_v10  ;;  %v89_v5 = vld [vmem:[#allocation7 + $0x40] sm:$0xff]  ;;  %v1778_v10 = vpack.c.bf16 %v92_v9, %v91_v8 }
  0x57   :  { %1311 = vmatprep.subr.bf16.mxu1 %v1310_v13  ;;  %v1774_v7 = vpack.c.bf16 %v90_v6, %v89_v5 }
  0x59   :  { %1285 = vmatpush3.bf16.msra.mxu0 %v1284_v16  ;;  %v1786_v16 = vpack.c.bf16 %v96_v15, %v95_v14 }
  0x5a   :  { %1313 = vmatpush3.bf16.msra.mxu1 %v1310_v13  ;;  %1318 = vmatprep.subr.bf16.mxu0 %v1546_v59  ;;  %v1782_v13 = vpack.c.bf16 %v94_v12, %v93_v11 }
  0x5b   :  { %1315 = vmatprep.subr.bf16.mxu1 %v1314_v17 }
  0x5e   :  { %1317 = vmatpush3.bf16.msra.mxu1 %v1314_v17  ;;  %v1548_v17 = vmov 0.0  }
  0xb7   :  { %v1715_v30 = vpop.permute.xlu1 %151  ;;  %v1717_v31 = vpop.permute.xlu0 %118 }
  0xb8   :  { %v136_v32 = vmul.f32 %v1717_v31, %v115_v26  ;;  %v169_v33 = vmul.f32 %v1715_v30, %v147_v27 }
  0xba   :  { %286 = vmatmul.mubr.f32.vlgmr.msra.gmra.mrb[0].mxu0 %v136_v32  ;;  %1140 = vmatprep.mubr.f32.mxu1 %v169_v33 }
  0xbb   :  { %v1726_v38 = vpop.permute.xlu1 %128  ;;  %v1728_v39 = vpop.permute.xlu0 %123  ;;  %290 = vmatprep.mubr.f32.mxu0 %v1697_v21  ;;  %1320 = vmatpush3.bf16.msra.mxu0 %v1757_v58 }
  0xbc   :  { %v137_v40 = vmul.f32 %v1728_v39, %v114_v35  ;;  %v138_v46 = vmul.f32 %v1726_v38, %v113_v41  ;;  %1321 = vmatprep.subr.bf16.mxu0 %v1546_v59 }
  0xbe   :  { %291 = vmatmul.mubr.f32.gmra.mrb[2].mxu0 %v137_v40 }
  0xbf   :  { %v1738_v44 = vpop.permute.xlu1 %161  ;;  %v1740_v45 = vpop.permute.xlu0 %156  ;;  %295 = vmatprep.mubr.f32.mxu0 %v1713_v29  ;;  %1323 = vmatpush3.bf16.msra.mxu0 %v1762_v62 }
  0xc0   :  { %v171_v47 = vmul.f32 %v1738_v44, %v145_v42  ;;  %v170_v48 = vmul.f32 %v1740_v45, %v146_v43  ;;  %1324 = vmatprep.subr.bf16.mxu0 %v1546_v59 }
  0xc2   :  { %296 = vmatmul.mubr.f32.gmra.mrb[4].mxu0 %v138_v46  ;;  %1141 = vmatmul.mubr.f32.vlgmr.msra.gmra.mrb[0].mxu1 %v170_v48 }
  0xc3   :  { %v1750_v51 = vpop.permute.xlu1 %166  ;;  %v1752_v52 = vpop.permute.xlu0 %133  ;;  %1143 = vmatprep.mubr.f32.mxu1 %v171_v47  ;;  %300 = vmatprep.mubr.f32.mxu0 %v1692_v20 }
  0xc4   :  { %v172_v53 = vmul.f32 %v1750_v51, %v148_v49  ;;  %v139_v55 = vmul.f32 %v1752_v52, %v112_v50  ;;  %1326 = vmatpush3.bf16.msra.mxu0 %v1766_v1 }
  0xc5   :  { %1327 = vmatprep.subr.bf16.mxu0 %v1546_v59 }
  0xc6   :  { %301 = vmatmul.mubr.f32.gmra.mrb[6].mxu0 %v139_v55  ;;  %1144 = vmatmul.mubr.f32.gmra.mrb[2].mxu1 %v172_v53 }
  0xc7   :  { %1178 = vmatprep.mubr.msk.f32.mxu0 %vm1547_vm2, %v1548_v17 }
  0xc8   :  { %1329 = vmatpush3.bf16.msra.mxu0 %v1770_v4 }
  0xc9   :  { %1330 = vmatprep.subr.bf16.mxu0 %v1546_v59 }
  0xcc   :  { %1332 = vmatpush3.bf16.msra.mxu0 %v1774_v7 }
  0xcd   :  { %1333 = vmatprep.subr.bf16.mxu0 %v1546_v59 }
  0xd0   :  { %1335 = vmatpush3.bf16.msra.mxu0 %v1778_v10 }
  0xd1   :  { %1336 = vmatprep.subr.bf16.mxu0 %v1546_v59 }
  0xd4   :  { %1338 = vmatpush3.bf16.msra.mxu0 %v1782_v13 }
  0xd5   :  { %1339 = vmatprep.subr.bf16.mxu0 %v1546_v59 }
  0xd8   :  { %1341 = vmatpush3.bf16.msra.mxu0 %v1786_v16 }
 0x18d   :  { %v978_v18 = vpop.f32.mrb[0].mxu0 }
 0x18e   :  { %v979_v22 = vpop.f32.mrb[1].mxu0 }
 0x18f   :  { %v980_v23 = vadd.f32 %v979_v22, %v978_v18 }
 0x191   :  { %v981_v24 = vpop.f32.mrb[2].mxu0 }
 0x192   :  { %v982_v25 = vpop.f32.mrb[3].mxu0 }
 0x193   :  { %v983_v26 = vadd.f32 %v982_v25, %v981_v24  ;;  %v573_v24 = vld [vmem:[#allocation5 + $0x80] sm:$0xff]  ;;  %v574_v25 = vld [vmem:[#allocation5 + $0x88] sm:$0xff] }
 0x195   :  { %v984_v27 = vpop.f32.mrb[4].mxu0  ;;  %v1142_v28 = vpop.f32.mrb[0].mxu1 }
 0x196   :  { %v1791_v32 = vadd.f32 %v1142_v28, %v983_v26  ;;  %v985_v33 = vpop.f32.mrb[5].mxu0  ;;  %v372_v34 = vpop.f32.mrb[1].mxu1  ;;  %v1342_v26 = vpack.c.bf16 %v574_v25, %v573_v24  ;;  %v558_v28 = vld [vmem:[#allocation5 + $0x8] sm:$0xff] }
 0x197   :  { %v986_v35 = vadd.f32 %v985_v33, %v984_v27  ;;  %v1793_v36 = vadd.f32 %v980_v23, %v372_v34  ;;  %v557_v27 = vld [vmem:[#allocation5] sm:$0xff]  ;;  %v582_v24 = vld [vmem:[#allocation5 + $0xc8] sm:$0xff] }
 0x198   :  { %v403_v37 = vmul.f32 %v1791_v32, %v1791_v32  ;;  %v589_v33 = vld [vmem:[#allocation5 + $0x100] sm:$0xff]  ;;  %v1344_v34 = vpack.c.bf16 %v558_v28, %v557_v27  ;;  %1343 = vmatprep.subr.bf16.mxu1 %v1342_v26  ;;  %v566_v27 = vld [vmem:[#allocation5 + $0x48] sm:$0xff] }
 0x199   :  { %v402_v40 = vmul.f32 %v1793_v36, %v1793_v36  ;;  %v987_v41 = vpop.f32.mrb[6].mxu0  ;;  %v1145_v42 = vpop.f32.mrb[2].mxu1  ;;  %v393_v47 = vadd.f32 %v1791_v32, %v1793_v36  ;;  %v565_v26 = vld [vmem:[#allocation5 + $0x40] sm:$0xff] }
 0x19a   :  { %v988_v43 = vpop.f32.mrb[7].mxu0  ;;  %v382_v46 = vpop.f32.mrb[3].mxu1  ;;  %1345 = vmatpush3.bf16.msra.mxu1 %v1344_v34  ;;  %v597_v28 = vld [vmem:[#allocation5 + $0x140] sm:$0xff]  ;;  %v598_v34 = vld [vmem:[#allocation5 + $0x148] sm:$0xff] }
 0x19b   :  { %v989_v48 = vadd.f32 %v988_v43, %v987_v41  ;;  %v1801_v49 = vadd.f32 %v986_v35, %v382_v46  ;;  %v406_v50 = vadd.f32 %v403_v37, %v402_v40  ;;  %v590_v35 = vld [vmem:[#allocation5 + $0x108] sm:$0xff]  ;;  %v575_v40 = vld [vmem:[#allocation5 + $0x90] sm:$0xff]  ;;  %v576_v41 = vld [vmem:[#allocation5 + $0x98] sm:$0xff] }
 0x19c   :  { %v1374_v37 = vpack.c.bf16 %v590_v35, %v589_v33  ;;  %v559_v43 = vld [vmem:[#allocation5 + $0x10] sm:$0xff]  ;;  %v560_v46 = vld [vmem:[#allocation5 + $0x18] sm:$0xff]  ;;  %v1360_v33 = vpack.c.bf16 %v566_v27, %v565_v26  ;;  %v1390_v35 = vpack.c.bf16 %v598_v34, %v597_v28  ;;  %v942_v34 = vld [vmem:[%s1906_s6] ss:$0 sm:$0xff] }
 0x19d   :  { %v1803_v53 = vadd.f32 %v1145_v42, %v989_v48  ;;  %v394_v55 = vadd.f32 %v393_v47, %v1801_v49  ;;  %v404_v56 = vmul.f32 %v1801_v49, %v1801_v49  ;;  %v1346_v42 = vpack.c.bf16 %v576_v41, %v575_v40  ;;  %v591_v47 = vld [vmem:[#allocation5 + $0x110] sm:$0xff]  ;;  %v584_v40 = vld [vmem:[#allocation5 + $0xd8] sm:$0xff] }
 0x19e   :  { %1375 = vmatprep.subr.bf16.mxu0 %v1374_v37  ;;  %v1348_v48 = vpack.c.bf16 %v560_v46, %v559_v43  ;;  %v568_v43 = vld [vmem:[#allocation5 + $0x58] sm:$0xff]  ;;  %v599_v46 = vld [vmem:[#allocation5 + $0x150] sm:$0xff] }
 0x19f   :  { %v405_v57 = vmul.f32 %v1803_v53, %v1803_v53  ;;  %v395_v60 = vadd.f32 %v394_v55, %v1803_v53  ;;  %v407_v61 = vadd.f32 %v406_v50, %v404_v56  ;;  %v592_v50 = vld [vmem:[#allocation5 + $0x118] sm:$0xff]  ;;  %1347 = vmatprep.subr.bf16.mxu1 %v1346_v42  ;;  %v577_v56 = vld [vmem:[#allocation5 + $0xa0] sm:$0xff]  ;;  %v567_v42 = vld [vmem:[#allocation5 + $0x50] sm:$0xff] }
 0x1a0   :  { %v1378_v55 = vpack.c.bf16 %v592_v50, %v591_v47  ;;  %1349 = vmatpush3.bf16.msra.mxu1 %v1348_v48  ;;  %v1364_v47 = vpack.c.bf16 %v568_v43, %v567_v42  ;;  %v600_v48 = vld [vmem:[#allocation5 + $0x158] sm:$0xff] }
 0x1a1   :  { %v396_v63 = vrot.slane %v395_v60, 4  ;;  %v408_v0 = vadd.f32 %v407_v61, %v405_v57  ;;  %v578_v57 = vld [vmem:[#allocation5 + $0xa8] sm:$0xff]  ;;  %v561_v61 = vld [vmem:[#allocation5 + $0x20] sm:$0xff]  ;;  %v1394_v50 = vpack.c.bf16 %v600_v48, %v599_v46 }
 0x1a3   :  { %v397_v2 = vadd.f32 %v396_v63, %v395_v60  ;;  %v409_v3 = vrot.slane %v408_v0, 4  ;;  %v1350_v60 = vpack.c.bf16 %v578_v57, %v577_v56  ;;  %v562_v63 = vld [vmem:[#allocation5 + $0x28] sm:$0xff]  ;;  %v569_v57 = vld [vmem:[#allocation5 + $0x60] sm:$0xff] }
 0x1a4   :  { %v586_v56 = vld [vmem:[#allocation5 + $0xe8] sm:$0xff] }
 0x1a5   :  { %v398_v5 = vrot.slane %v397_v2, 2  ;;  %v410_v6 = vadd.f32 %v409_v3, %v408_v0  ;;  %v593_v0 = vld [vmem:[#allocation5 + $0x120] sm:$0xff]  ;;  %v594_v3 = vld [vmem:[#allocation5 + $0x128] sm:$0xff]  ;;  %1351 = vmatprep.subr.bf16.mxu1 %v1350_v60 }
 0x1a7   :  { %v399_v8 = vadd.f32 %v398_v5, %v397_v2  ;;  %v411_v9 = vrot.slane %v410_v6, 2  ;;  %v1352_v2 = vpack.c.bf16 %v562_v63, %v561_v61  ;;  %v1382_v5 = vpack.c.bf16 %v594_v3, %v593_v0  ;;  %v570_v61 = vld [vmem:[#allocation5 + $0x68] sm:$0xff]  ;;  %v601_v63 = vld [vmem:[#allocation5 + $0x160] sm:$0xff] }
 0x1a8   :  { %v602_v0 = vld [vmem:[#allocation5 + $0x168] sm:$0xff] }
 0x1a9   :  { %v400_v11 = vrot.slane %v399_v8, 1  ;;  %v412_v12 = vadd.f32 %v411_v9, %v410_v6  ;;  %1353 = vmatpush3.bf16.msra.mxu1 %v1352_v2  ;;  %v579_v6 = vld [vmem:[#allocation5 + $0xb0] sm:$0xff]  ;;  %v1368_v2 = vpack.c.bf16 %v570_v61, %v569_v57  ;;  %v1398_v3 = vpack.c.bf16 %v602_v0, %v601_v63 }
 0x1ab   :  { %v413_v14 = vrot.slane %v412_v12, 1  ;;  %v401_v15 = vadd.f32 %v400_v11, %v399_v8  ;;  %v580_v8 = vld [vmem:[#allocation5 + $0xb8] sm:$0xff]  ;;  %v563_v11 = vld [vmem:[#allocation5 + $0x30] sm:$0xff] }
 0x1ac   :  { %v1354_v9 = vpack.c.bf16 %v580_v8, %v579_v6  ;;  %v588_v6 = vld [vmem:[#allocation5 + $0xf8] sm:$0xff] }
 0x1ad   :  { %v414_v18 = vadd.f32 %v413_v14, %v412_v12  ;;  %v564_v12 = vld [vmem:[#allocation5 + $0x38] sm:$0xff]  ;;  %v595_v14 = vld [vmem:[#allocation5 + $0x130] sm:$0xff] }
 0x1ae   :  { %1355 = vmatprep.subr.bf16.mxu1 %v1354_v9  ;;  %v571_v9 = vld [vmem:[#allocation5 + $0x70] sm:$0xff] }
 0x1af   :  { %v416_v22 = vsel %vm415_vm3, %v401_v15, %v414_v18  ;;  %v1356_v15 = vpack.c.bf16 %v564_v12, %v563_v11  ;;  %v596_v18 = vld [vmem:[#allocation5 + $0x138] sm:$0xff]  ;;  %v603_v12 = vld [vmem:[#allocation5 + $0x170] sm:$0xff] }
 0x1b0   :  { %v417_v23 = vmul.f32 0.03125, %v416_v22  ;;  %v1386_v22 = vpack.c.bf16 %v596_v18, %v595_v14  ;;  %v572_v11 = vld [vmem:[#allocation5 + $0x78] sm:$0xff] }
 0x1b1   :  { %1357 = vmatpush3.bf16.msra.mxu1 %v1356_v15  ;;  %v1372_v14 = vpack.c.bf16 %v572_v11, %v571_v9  ;;  %v604_v15 = vld [vmem:[#allocation5 + $0x178] sm:$0xff] }
 0x1b2   :  { %1179 = vmatmul.mubr.f32.vlgmr.msra.gmra.mrb[8].mxu0 %v417_v23  ;;  %v581_v23 = vld [vmem:[#allocation5 + $0xc0] sm:$0xff]  ;;  %v1402_v18 = vpack.c.bf16 %v604_v15, %v603_v12 }
 0x1b3   :  { %1377 = vmatpush3.bf16.msra.mxu0 %v1374_v37  ;;  %v1358_v25 = vpack.c.bf16 %v582_v24, %v581_v23  ;;  %v583_v37 = vld [vmem:[#allocation5 + $0xd0] sm:$0xff] }
 0x1b4   :  { %1379 = vmatprep.subr.bf16.mxu0 %v1378_v55  ;;  %v1362_v41 = vpack.c.bf16 %v584_v40, %v583_v37  ;;  %v513_v37 = vsub.s32 1, %v1687_v19 }
 0x1b5   :  { %1359 = vmatprep.subr.bf16.mxu1 %v1358_v25 }
 0x1b6   :  { %1361 = vmatpush3.bf16.msra.mxu1 %v1360_v33  ;;  %v505_v33 = vsub.s32 0, %v1687_v19 }
 0x1b7   :  { %1381 = vmatpush3.bf16.msra.mxu0 %v1378_v55  ;;  %1363 = vmatprep.subr.bf16.mxu1 %v1362_v41  ;;  %v585_v55 = vld [vmem:[#allocation5 + $0xe0] sm:$0xff] }
 0x1b8   :  { %1383 = vmatprep.subr.bf16.mxu0 %v1382_v5  ;;  %v1366_v60 = vpack.c.bf16 %v586_v56, %v585_v55 }
 0x1ba   :  { %1365 = vmatpush3.bf16.msra.mxu1 %v1364_v47 }
 0x1bb   :  { %1385 = vmatpush3.bf16.msra.mxu0 %v1382_v5  ;;  %1367 = vmatprep.subr.bf16.mxu1 %v1366_v60  ;;  %v587_v5 = vld [vmem:[#allocation5 + $0xf0] sm:$0xff] }
 0x1bc   :  { %1387 = vmatprep.subr.bf16.mxu0 %v1386_v22  ;;  %v1370_v8 = vpack.c.bf16 %v588_v6, %v587_v5 }
 0x1be   :  { %1369 = vmatpush3.bf16.msra.mxu1 %v1368_v2 }
 0x1bf   :  { %1389 = vmatpush3.bf16.msra.mxu0 %v1386_v22  ;;  %1371 = vmatprep.subr.bf16.mxu1 %v1370_v8 }
 0x1c0   :  { %1391 = vmatprep.subr.bf16.mxu0 %v1390_v35 }
 0x1c2   :  { %1373 = vmatpush3.bf16.msra.mxu1 %v1372_v14 }
 0x1c3   :  { %1393 = vmatpush3.bf16.msra.mxu0 %v1390_v35  ;;  %1406 = vmatprep.subr.bf16.mxu1 %v1546_v59 }
 0x1c4   :  { %1395 = vmatprep.subr.bf16.mxu0 %v1394_v50 }
 0x1c7   :  { %1397 = vmatpush3.bf16.msra.mxu0 %v1394_v50  ;;  %v943_v50 = vld [vmem:[%s1907_s7] ss:$0 sm:$0xff] }
 0x1c8   :  { %1399 = vmatprep.subr.bf16.mxu0 %v1398_v3 }
 0x1cb   :  { %1401 = vmatpush3.bf16.msra.mxu0 %v1398_v3 }
 0x1cc   :  { %1403 = vmatprep.subr.bf16.mxu0 %v1402_v18 }
 0x1cf   :  { %1405 = vmatpush3.bf16.msra.mxu0 %v1402_v18 }
 0x285   :  { %v484_v22 = vpop.f32.mrb[8].mxu0 }
 0x286   :  { %v488_v23 = vmul.f32 %v484_v22, %v484_v22  ;;  %v1180_v24 = vpop.f32.mrb[9].mxu0  ;;  %v506_v35 = vrot.slane %v484_v22, %v505_v33 }
 0x288   :  { %v490_v25 = vrot.slane %v488_v23, 7  ;;  %v508_v42 = vsub.f32 %v1791_v32, %v506_v35  ;;  %v509_v43 = vsub.f32 %v1801_v49, %v506_v35  ;;  %v510_v46 = vsub.f32 %v1803_v53, %v506_v35 }
 0x289   :  { %v507_v48 = vsub.f32 %v1793_v36, %v506_v35 }
 0x28a   :  { %v492_v26 = vsub.f32 %v484_v22, %v490_v25 }
 0x28c   :  { %v493_v27 = vmax.f32 %v492_v26, 0.0 }
 0x28e   :  { %v494_v28 = vadd.f32 1e-05, %v493_v27 }
 0x290   :  { %1442 = vrsqrt.f32 %v494_v28 }
 0x29a   :  { %v1443_v40 = vpop.eup %1442 }
 0x29b   :  { %v502_v41 = vmul.f32 %v1443_v40, %v942_v34 }
 0x29d   :  { %v514_v47 = vrot.slane %v502_v41, %v513_v37 }
 0x29f   :  { %v516_v55 = vmul.f32 %v514_v47, %v508_v42  ;;  %v517_v56 = vmul.f32 %v514_v47, %v509_v43  ;;  %v518_v57 = vmul.f32 %v514_v47, %v510_v46  ;;  %v515_v60 = vmul.f32 %v514_v47, %v507_v48 }
 0x2a1   :  { %v525_v61 = vadd.f32 %v943_v50, %v515_v60  ;;  %v526_v63 = vadd.f32 %v943_v50, %v516_v55  ;;  %v527_v32 = vadd.f32 %v943_v50, %v517_v56  ;;  %v528_v0 = vadd.f32 %v943_v50, %v518_v57 }
 0x2a3   :  { %v529_v49 = vmax.f32 %v525_v61, 0.0  ;;  %v530_v2 = vmax.f32 %v526_v63, 0.0  ;;  %v531_v53 = vmax.f32 %v527_v32, 0.0  ;;  %v532_v3 = vmax.f32 %v528_v0, 0.0 }
 0x2a5   :  { %v533_v5 = vrot.slane %v529_v49, 7  ;;  %v545_v6 = vrot.slane %v529_v49, 1  ;;  %669 = vmatprep.mubr.f32.mxu1 %v529_v49  ;;  %v536_v36 = vrot.slane %v532_v3, 7  ;;  %v546_v8 = vrot.slane %v530_v2, 1 }
 0x2a6   :  { %v547_v9 = vrot.slane %v531_v53, 1  ;;  %v548_v11 = vrot.slane %v532_v3, 1  ;;  %v534_v12 = vrot.slane %v530_v2, 7  ;;  %v535_v27 = vrot.slane %v531_v53, 7 }
 0x2a7   :  { %v540_v14 = vsel %vm111_vm0, %v536_v36, %v533_v5  ;;  %v551_v15 = vsel %vm144_vm1, %v545_v6, %v546_v8 }
 0x2a8   :  { %v541_v18 = vmul.f32 %v540_v14, %v1717_v31  ;;  %v553_v22 = vmul.f32 %v551_v15, %v1715_v30  ;;  %v550_v23 = vsel %vm144_vm1, %v546_v8, %v547_v9  ;;  %v549_v24 = vsel %vm144_vm1, %v547_v9, %v548_v11 }
 0x2a9   :  { %v554_v25 = vmul.f32 %v550_v23, %v1740_v45  ;;  %v539_v26 = vsel %vm111_vm0, %v533_v5, %v534_v12  ;;  %v555_v28 = vmul.f32 %v549_v24, %v1738_v44  ;;  %v552_v31 = vsel %vm144_vm1, %v548_v11, %v545_v6 }
 0x2aa   :  { %670 = vmatmul.mubr.f32.vlgmr.msra.gmra.mrb[4].mxu1 %v541_v18  ;;  %1213 = vmatprep.mubr.f32.mxu0 %v553_v22  ;;  %v542_v30 = vmul.f32 %v539_v26, %v1728_v39  ;;  %v556_v45 = vmul.f32 %v552_v31, %v1750_v51  ;;  %v538_v34 = vsel %vm111_vm0, %v534_v12, %v535_v27 }
 0x2ab   :  { %674 = vmatprep.mubr.f32.mxu1 %v530_v2  ;;  %1214 = vmatmul.mubr.f32.vlgmr.msra.gmra.mrb[10].mxu0 %v554_v25  ;;  %v543_v44 = vmul.f32 %v538_v34, %v1726_v38  ;;  %v537_v35 = vsel %vm111_vm0, %v535_v27, %v536_v36 }
 0x2ac   :  { %1216 = vmatprep.mubr.f32.mxu0 %v555_v28  ;;  %1408 = vmatpush3.bf16.msra.mxu1 %v1757_v58  ;;  %v544_v39 = vmul.f32 %v537_v35, %v1752_v52 }
 0x2ad   :  { %1409 = vmatprep.subr.bf16.mxu1 %v1546_v59 }
 0x2ae   :  { %675 = vmatmul.mubr.f32.gmra.mrb[6].mxu1 %v542_v30  ;;  %v944_v30 = vld [vmem:[%s1908_s8] ss:$0 sm:$0xff]  ;;  %s1549_s8 = smov [#allocation8]  }
 0x2af   :  { %679 = vmatprep.mubr.f32.mxu1 %v531_v53  ;;  %1217 = vmatmul.mubr.f32.gmra.mrb[12].mxu0 %v556_v45  ;;  %s929_s3 = sshll.u32 %s1549_s8, 4  ;;  %s930_s3 = int_to_ptr.vmem [resolvable:$true] %s929_s3 }
 0x2b0   :  { %1411 = vmatpush3.bf16.msra.mxu1 %v1762_v62  ;;  %p1517_p11 = scmp.lt.s32.totalorder %s930_s3, %s930_s3 }
 0x2b1   :  { %1412 = vmatprep.subr.bf16.mxu1 %v1546_v59 }
 0x2b2   :  { %680 = vmatmul.mubr.f32.gmra.mrb[8].mxu1 %v543_v44 }
 0x2b3   :  { %684 = vmatprep.mubr.f32.mxu1 %v532_v3 }
 0x2b4   :  { %1414 = vmatpush3.bf16.msra.mxu1 %v1766_v1 }
 0x2b5   :  { %1415 = vmatprep.subr.bf16.mxu1 %v1546_v59 }
 0x2b6   :  { %685 = vmatmul.mubr.f32.gmra.mrb[10].mxu1 %v544_v39 }
 0x2b7   :  { %1251 = vmatprep.mubr.msk.f32.mxu1 %vm1547_vm2, %v1548_v17 }
 0x2b8   :  { %1417 = vmatpush3.bf16.msra.mxu1 %v1770_v4 }
 0x2b9   :  { %1418 = vmatprep.subr.bf16.mxu1 %v1546_v59 }
 0x2bc   :  { %1420 = vmatpush3.bf16.msra.mxu1 %v1774_v7 }
 0x2bd   :  { %1421 = vmatprep.subr.bf16.mxu1 %v1546_v59 }
 0x2c0   :  { %1423 = vmatpush3.bf16.msra.mxu1 %v1778_v10 }
 0x2c1   :  { %1424 = vmatprep.subr.bf16.mxu1 %v1546_v59 }
 0x2c4   :  { %1426 = vmatpush3.bf16.msra.mxu1 %v1782_v13 }
 0x2c5   :  { %1427 = vmatprep.subr.bf16.mxu1 %v1546_v59 }
 0x2c8   :  { %1429 = vmatpush3.bf16.msra.mxu1 %v1786_v16 }
 0x37d   :  { %v1059_v38 = vpop.f32.mrb[4].mxu1 }
 0x37e   :  { %v1060_v51 = vpop.f32.mrb[5].mxu1  ;;  %v1215_v52 = vpop.f32.mrb[10].mxu0 }
 0x37f   :  { %v1061_v58 = vadd.f32 %v1060_v51, %v1059_v38  ;;  %v756_v62 = vpop.f32.mrb[11].mxu0 }
 0x381   :  { %v757_v1 = vadd.f32 %v1061_v58, %v756_v62  ;;  %v1062_v4 = vpop.f32.mrb[6].mxu1  ;;  %v945_v58 = vld [vmem:[%s1909_s9] ss:$0 sm:$0xff]  ;;  %s1512_s9 = scalar_lea.vmem %s930_s3, 512 }
 0x382   :  { %v1063_v7 = vpop.f32.mrb[7].mxu1  ;;  %v1218_v17 = vpop.f32.mrb[12].mxu0  ;;  %p1513_p10 = scmp.ne.s32.totalorder %s930_s3, %s1512_s9  ;;  %p1518_p12 = scmp.lt.s32.totalorder %s1512_s9, %s1512_s9 }
 0x383   :  { %v1064_v40 = vadd.f32 %v1063_v7, %v1062_v4  ;;  %v766_v41 = vpop.f32.mrb[13].mxu0  ;;  %v786_v16 = vmul.f32 %v757_v1, %v757_v1 }
 0x384   :  { %p1519_p13 = por %p1518_p12, %p1517_p11 }
 0x385   :  { %v762_v10 = vadd.f32 %v1215_v52, %v1064_v40  ;;  %v1065_v42 = vpop.f32.mrb[8].mxu1 }
 0x386   :  { %v1066_v43 = vpop.f32.mrb[9].mxu1  ;;  %p1520_p0 = pnand %p1519_p13, %p1513_p10 }
 0x387   :  { %v1067_v46 = vadd.f32 %v1066_v43, %v1065_v42  ;;  %v787_v13 = vmul.f32 %v762_v10, %v762_v10  ;;  %v777_v50 = vadd.f32 %v762_v10, %v757_v1 }
 0x389   :  { %v767_v47 = vadd.f32 %v1067_v46, %v766_v41  ;;  %v1068_v59 = vpop.f32.mrb[10].mxu1  ;;  %v790_v57 = vadd.f32 %v787_v13, %v786_v16 }
 0x38a   :  { %v1069_v48 = vpop.f32.mrb[11].mxu1 }
 0x38b   :  { %v788_v55 = vmul.f32 %v767_v47, %v767_v47  ;;  %v1070_v56 = vadd.f32 %v1069_v48, %v1068_v59  ;;  %v778_v60 = vadd.f32 %v777_v50, %v767_v47 }
 0x38d   :  { %v772_v61 = vadd.f32 %v1218_v17, %v1070_v56  ;;  %v791_v63 = vadd.f32 %v790_v57, %v788_v55 }
 0x38f   :  { %v779_v32 = vadd.f32 %v778_v60, %v772_v61  ;;  %v789_v0 = vmul.f32 %v772_v61, %v772_v61 }
 0x391   :  { %v780_v49 = vrot.slane %v779_v32, 4  ;;  %v792_v2 = vadd.f32 %v791_v63, %v789_v0 }
 0x393   :  { %v781_v53 = vadd.f32 %v780_v49, %v779_v32  ;;  %v793_v3 = vrot.slane %v792_v2, 4 }
 0x395   :  { %v782_v5 = vrot.slane %v781_v53, 2  ;;  %v794_v6 = vadd.f32 %v793_v3, %v792_v2 }
 0x397   :  { %v783_v36 = vadd.f32 %v782_v5, %v781_v53  ;;  %v795_v8 = vrot.slane %v794_v6, 2 }
 0x399   :  { %v784_v9 = vrot.slane %v783_v36, 1  ;;  %v796_v11 = vadd.f32 %v795_v8, %v794_v6 }
 0x39b   :  { %v797_v12 = vrot.slane %v796_v11, 1  ;;  %v785_v14 = vadd.f32 %v784_v9, %v783_v36 }
 0x39d   :  { %v798_v15 = vadd.f32 %v797_v12, %v796_v11 }
 0x39f   :  { %v799_v18 = vsel %vm415_vm3, %v785_v14, %v798_v15 }
 0x3a0   :  { %v800_v22 = vmul.f32 0.03125, %v799_v18 }
 0x3a2   :  { %1252 = vmatmul.mubr.f32.vlgmr.msra.gmra.mrb[12].mxu1 %v800_v22 }
 0x475   :  { %v867_v23 = vpop.f32.mrb[12].mxu1 }
 0x476   :  { %v871_v24 = vmul.f32 %v867_v23, %v867_v23  ;;  %v1253_v25 = vpop.f32.mrb[13].mxu1  ;;  %v889_v45 = vrot.slane %v867_v23, %v505_v33 }
 0x478   :  { %v873_v26 = vrot.slane %v871_v24, 7  ;;  %v890_v35 = vsub.f32 %v757_v1, %v889_v45  ;;  %v891_v39 = vsub.f32 %v762_v10, %v889_v45  ;;  %v892_v38 = vsub.f32 %v767_v47, %v889_v45 }
 0x479   :  { %v893_v51 = vsub.f32 %v772_v61, %v889_v45 }
 0x47a   :  { %v875_v27 = vsub.f32 %v867_v23, %v873_v26 }
 0x47c   :  { %v876_v28 = vmax.f32 %v875_v27, 0.0 }
 0x47e   :  { %v877_v31 = vadd.f32 1e-05, %v876_v28 }
 0x480   :  { %1444 = vrsqrt.f32 %v877_v31 }
 0x48a   :  { %v1445_v34 = vpop.eup %1444 }
 0x48b   :  { %v885_v44 = vmul.f32 %v1445_v34, %v944_v30 }
 0x48d   :  { %v897_v52 = vrot.slane %v885_v44, %v513_v37 }
 0x48f   :  { %v898_v62 = vmul.f32 %v897_v52, %v890_v35  ;;  %v899_v4 = vmul.f32 %v897_v52, %v891_v39  ;;  %v900_v7 = vmul.f32 %v897_v52, %v892_v38  ;;  %v901_v17 = vmul.f32 %v897_v52, %v893_v51 }
 0x491   :  { %v908_v40 = vadd.f32 %v945_v58, %v898_v62  ;;  %v909_v41 = vadd.f32 %v945_v58, %v899_v4  ;;  %v910_v33 = vadd.f32 %v945_v58, %v900_v7  ;;  %v911_v42 = vadd.f32 %v945_v58, %v901_v17 }
 0x493   :  { %v912_v1 = vadd.f32 %v908_v40, %v1684_v54  ;;  %v913_v10 = vadd.f32 %v909_v41, %v1697_v21  ;;  %v914_v19 = vadd.f32 %v910_v33, %v1713_v29  ;;  %v915_v37 = vadd.f32 %v911_v42, %v1692_v20 }
 0x495   :  { %v916_v43 = vmax.f32 %v912_v1, 0.0  ;;  %v917_v46 = vmax.f32 %v913_v10, 0.0  ;;  %v918_v13 = vmax.f32 %v914_v19, 0.0  ;;  %v919_v47 = vmax.f32 %v915_v37, 0.0 }
 0x497   :  { %920 = vst [vmem:[#allocation8] sm:$0xff] %v916_v43  ;;  %921 = vst [vmem:[#allocation8 + $0x8] sm:$0xff] %v917_v46 }
 0x498   :  { %922 = vst [vmem:[#allocation8 + $0x10] sm:$0xff] %v918_v13  ;;  %923 = vst [vmem:[#allocation8 + $0x18] sm:$0xff] %v919_v47 }
 0x499   :  { %1523 = shalt.err (!%p1520_p0)
}
 0x49a   :  { %s1524_s19 = scalar_lea.hbm %s1910_s10, 512 }
 0x49b   :  { %p1525_p1 = scmp.ne.s32.totalorder %s1910_s10, %s1524_s19  ;;  %p1528_p2 = scmp.lt.u32.totalorder %s1524_s19, %s1910_s10 }
 0x49d   :  { %p1530_p3 = pnand %p1528_p2, %p1525_p1 }
 0x49f   :  { %1533 = shalt.err (!%p1530_p3)
}
 0x4a0   :  { %935 = dma.vmem_to_hbm [thread:$0]  %s930_s3, 512, %s1910_s10, [#allocation4], %s1542_s25, %s1542_s25, %s1543_s26  }
 0x4a1   :  { %1538 = dma.done.wait [#allocation4], 512  }
 0x4a2   :  { %1539 = vsyncadd [#allocation4], 4294966784 }
 0x4a3   :  { %939 = vsyncpa [#allocation3], 1 }
 0x4a4   :  { %940 = vsyncpa [#allocation6], 1 }
 0x4a5   :  { %941 = vsyncpa [#allocation4], 1 }

</bundles_post_ra>
